<compile_context>
chip_gen: v7x
topology: tpu7x:2x2x1
jax: 0.10.0
libtpu: 0.0.40
codegen_flags: <defaults>
</compile_context>

<pallas_src>
import functools
import math

import jax
import jax.numpy as jnp
from jax.experimental import pallas as pl
from jax.experimental.pallas import tpu as pltpu

_LANE = 128       # vreg lane width: logits padded to this *inside* the kernel only
_SUBLANE = 8
_NEG_BIG = -1e30  # "minus infinity" f32 bias for padded logit columns (exp -> 0)


def _round_up(n, m):
    return ((n + m - 1) // m) * m


def _mlp_kernel(x_ref, w1_ref, b1_ref, w2_ref, b2_ref, y_ref, *, use_softmax, n_out):
    # x arrives as f32 (no extra wrapper-side HBM pass); narrow to bf16 on the
    # VPU right before the MXU. Accumulation + all elementwise math stay f32
    # (v5e VPU/EUP have no bf16 path; fine on v6e/v7x too).
    x = x_ref[...].astype(jnp.bfloat16)
    h = jnp.dot(x, w1_ref[...], preferred_element_type=jnp.float32)
    h = jnp.maximum(h + b1_ref[...], 0.0)

    # fc2 over the lane-padded (>=128) output columns; padded columns carry a
    # -1e30 f32 bias so the softmax reductions ignore them.
    y = jnp.dot(h.astype(jnp.bfloat16), w2_ref[...],
                preferred_element_type=jnp.float32)
    y = y + b2_ref[...]

    if use_softmax:
        m = jnp.max(y, axis=-1, keepdims=True)
        e = jnp.exp(y - m)
        denom = jnp.sum(e, axis=-1, keepdims=True)
        y = e * pl.reciprocal(denom, approx=True)  # EUP vrcp; clamp absorbs few-ulp error
        # Note: 1.0 - 1e-9 rounds to exactly 1.0 in f32 -> upper clamp is a
        # no-op, matching PyTorch float32 behavior.
        y = jnp.clip(y, 1e-9, 1.0 - 1e-9)

    # Store only the real columns: writeback is n_out lanes wide, not the
    # padded 128 used internally (saves 8x output HBM bytes at n_out=16).
    y_ref[...] = y[:, :n_out].astype(y_ref.dtype)


def mlp_forward(x, w1, b1, w2, b2, *, use_softmax=False, tile_m=512):
    """x: [B, n_inputs] f32; w1: [n_inputs, n_hidden]; b1: [1, n_hidden];
    w2: [n_hidden, n_outputs]; b2: [1, n_outputs]. Returns [B, n_outputs] f32.

    tile_m: batch tile per grid step. Small batches collapse to a single grid
    step. For very large B, 512-2048 keeps per-step overhead amortized while
    staying a few MiB of double-buffered x/y, well inside even v7x's
    32 MiB scoped / 64 MiB physical VMEM. On v7x, prefer a tile that leaves the
    grid length >= 2 so the "parallel" batch axis splits across both TCs.
    """
    B, n_in = x.shape
    n_hidden = w1.shape[1]
    n_out = w2.shape[1]

    # --- pad the logit dim to lane width on the (tiny, VMEM-resident) weights;
    #     the output array itself stays n_out wide --------------------------------
    n_out_pad = _round_up(max(n_out, _LANE), _LANE)
    if n_out_pad != n_out:
        w2p = jnp.zeros((n_hidden, n_out_pad), jnp.float32).at[:, :n_out].set(w2)
        b2p = jnp.full((1, n_out_pad), _NEG_BIG, jnp.float32).at[:, :n_out].set(b2)
    else:
        w2p, b2p = w2, b2

    # --- batch tiling: single step for small B, big tiles for large B;
    #     ragged final block handled by the pipeline (no zero-pad copy) ----------
    tile = max(_SUBLANE, min(tile_m, _round_up(B, _SUBLANE)))
    grid = (pl.cdiv(B, tile),)

    # Weights as bf16 MXU operands (one-time tiny cast); biases stay f32.
    w1_bf = w1.astype(jnp.bfloat16)
    w2_bf = w2p.astype(jnp.bfloat16)
    b1_f = b1.astype(jnp.float32)
    b2_f = b2p.astype(jnp.float32)

    kernel = functools.partial(_mlp_kernel, use_softmax=use_softmax, n_out=n_out)
    return pl.pallas_call(
        kernel,
        out_shape=jax.ShapeDtypeStruct((B, n_out), jnp.float32),
        grid=grid,
        in_specs=[
            pl.BlockSpec((tile, n_in), lambda i: (i, 0)),           # x tile (pipelined, f32)
            pl.BlockSpec((n_in, n_hidden), lambda i: (0, 0)),       # w1 (VMEM-resident)
            pl.BlockSpec((1, n_hidden), lambda i: (0, 0)),          # b1
            pl.BlockSpec((n_hidden, n_out_pad), lambda i: (0, 0)),  # w2 (VMEM-resident)
            pl.BlockSpec((1, n_out_pad), lambda i: (0, 0)),         # b2
        ],
        out_specs=pl.BlockSpec((tile, n_out), lambda i: (i, 0)),
        compiler_params=pltpu.CompilerParams(
            dimension_semantics=("parallel",)),  # batch tiles shard across TCs on v7x
    )(x.astype(jnp.float32), w1_bf, b1_f, w2_bf, b2_f)


def init_linear_params(key, fan_in, fan_out):
    """Deterministic init mimicking torch.nn.Linear default U[-1/sqrt(fan_in), 1/sqrt(fan_in)]."""
    kw, kb = jax.random.split(key)
    bound = 1.0 / math.sqrt(fan_in)
    # stored transposed vs PyTorch: [fan_in, fan_out]
    w = jax.random.uniform(kw, (fan_in, fan_out), jnp.float32, -bound, bound)
    b = jax.random.uniform(kb, (1, fan_out), jnp.float32, -bound, bound)
    return w, b


def _ref_forward(x, w1, b1, w2, b2, use_softmax):
    """Plain-JAX reference mirroring the kernel's bf16-operand / f32-accumulate numerics."""
    xf = x.astype(jnp.bfloat16).astype(jnp.float32)
    w1f = w1.astype(jnp.bfloat16).astype(jnp.float32)
    w2f = w2.astype(jnp.bfloat16).astype(jnp.float32)
    h = jnp.maximum(xf @ w1f + b1, 0.0)
    hf = h.astype(jnp.bfloat16).astype(jnp.float32)
    y = hf @ w2f + b2
    if use_softmax:
        y = jnp.clip(jax.nn.softmax(y, axis=-1), 1e-9, 1.0 - 1e-9)
    return y


# TODO(synk): Adam optimizer / .to(device) from the PyTorch module are training-side
# and not part of the forward pass; intentionally not translated.

if __name__ == "__main__":
    # Model(n_inputs=32, n_outputs=16, n_hidden=64, softmax=...); batch chosen so it
    # is NOT a multiple of 128 -> exercises the collapsed single-step path and,
    # with a forced small tile, the multi-step ragged-final-block path.
    n_inputs, n_hidden, n_outputs = 32, 64, 16
    batch = 200

    key = jax.random.PRNGKey(0)
    k_x, k_fc1, k_fc2 = jax.random.split(key, 3)

    x = jax.random.normal(k_x, (batch, n_inputs), jnp.float32)
    w1, b1 = init_linear_params(k_fc1, n_inputs, n_hidden)
    w2, b2 = init_linear_params(k_fc2, n_hidden, n_outputs)

    # softmax=False branch (raw fc2 logits), single grid step (tile = 200)
    y_logits = mlp_forward(x, w1, b1, w2, b2, use_softmax=False)
    jax.block_until_ready(y_logits)

    # softmax=True branch (softmax over last dim + clamp)
    y_probs = mlp_forward(x, w1, b1, w2, b2, use_softmax=True)
    jax.block_until_ready(y_probs)

    # tiny-batch path (single step; block extends past B, writes clamped)
    y_small = mlp_forward(x[:3], w1, b1, w2, b2, use_softmax=True)
    jax.block_until_ready(y_small)

    # forced small tile -> 4 grid steps with a ragged final block (no batch pad)
    y_multi = mlp_forward(x, w1, b1, w2, b2, use_softmax=True, tile_m=64)
    jax.block_until_ready(y_multi)

    logits_ref = _ref_forward(x, w1, b1, w2, b2, False)
    probs_ref = _ref_forward(x, w1, b1, w2, b2, True)

    assert y_logits.shape == (batch, n_outputs)
    assert y_probs.shape == (batch, n_outputs)
    assert jnp.allclose(y_logits, logits_ref, atol=2e-3, rtol=2e-3)
    assert jnp.allclose(y_probs, probs_ref, atol=2e-3, rtol=2e-3)
    assert jnp.allclose(y_small, probs_ref[:3], atol=2e-3, rtol=2e-3)
    assert jnp.allclose(y_multi, probs_ref, atol=2e-3, rtol=2e-3)

    print("KERNEL_OK")
</pallas_src>

<mosaic_0001>
module attributes {stable_mosaic.version = 11 : i64} {
  func.func @_mlp_kernel(%arg0: i32, %arg1: memref<200x32xf32, #tpu.memory_space<vmem>>, %arg2: memref<32x64xbf16, #tpu.memory_space<vmem>>, %arg3: memref<1x64xf32, #tpu.memory_space<vmem>>, %arg4: memref<64x128xbf16, #tpu.memory_space<vmem>>, %arg5: memref<1x128xf32, #tpu.memory_space<vmem>>, %arg6: memref<200x16xf32, #tpu.memory_space<vmem>>) attributes {dimension_semantics = [#tpu.dimension_semantics<parallel>], iteration_bounds = array<i64: 1>, scalar_prefetch = 0 : i64, scratch_operands = 0 : i64, tpu.core_type = #tpu.core_type<tc>, window_params = [{transform_indices = @transform_0, window_bounds = array<i64: 200, 32>}, {pipeline_mode = #tpu.pipeline_mode<synchronous>, transform_indices = @transform_1, window_bounds = array<i64: 32, 64>}, {pipeline_mode = #tpu.pipeline_mode<synchronous>, transform_indices = @transform_2, window_bounds = array<i64: 1, 64>}, {pipeline_mode = #tpu.pipeline_mode<synchronous>, transform_indices = @transform_3, window_bounds = array<i64: 64, 128>}, {pipeline_mode = #tpu.pipeline_mode<synchronous>, transform_indices = @transform_4, window_bounds = array<i64: 1, 128>}, {transform_indices = @transform_5, window_bounds = array<i64: 200, 16>}]} {
    %c0 = arith.constant 0 : index
    %c0_0 = arith.constant 0 : index
    %0 = vector.load %arg1[%c0, %c0_0] : memref<200x32xf32, #tpu.memory_space<vmem>>, vector<200x32xf32>
    %1 = arith.truncf %0 : vector<200x32xf32> to vector<200x32xbf16>
    %c0_1 = arith.constant 0 : index
    %c0_2 = arith.constant 0 : index
    %2 = vector.load %arg2[%c0_1, %c0_2] : memref<32x64xbf16, #tpu.memory_space<vmem>>, vector<32x64xbf16>
    %cst = arith.constant dense<0.000000e+00> : vector<200x64xf32>
    %3 = tpu.matmul %1, %2, %cst {dimension_numbers = #tpu.dot_dimension_numbers<[1], [0], [0], [1], [0, 0, 1, 1], [], []>} : vector<200x32xbf16>, vector<32x64xbf16>, vector<200x64xf32> -> vector<200x64xf32>
    %c0_3 = arith.constant 0 : index
    %c0_4 = arith.constant 0 : index
    %4 = vector.load %arg3[%c0_3, %c0_4] : memref<1x64xf32, #tpu.memory_space<vmem>>, vector<1x64xf32>
    %5 = vector.broadcast %4 : vector<1x64xf32> to vector<200x64xf32>
    %6 = arith.addf %3, %5 : vector<200x64xf32>
    %cst_5 = arith.constant 0.000000e+00 : f32
    %7 = vector.broadcast %cst_5 : f32 to vector<200x64xf32>
    %8 = arith.maximumf %6, %7 : vector<200x64xf32>
    %9 = arith.truncf %8 : vector<200x64xf32> to vector<200x64xbf16>
    %c0_6 = arith.constant 0 : index
    %c0_7 = arith.constant 0 : index
    %10 = vector.load %arg4[%c0_6, %c0_7] : memref<64x128xbf16, #tpu.memory_space<vmem>>, vector<64x128xbf16>
    %cst_8 = arith.constant dense<0.000000e+00> : vector<200x128xf32>
    %11 = tpu.matmul %9, %10, %cst_8 {dimension_numbers = #tpu.dot_dimension_numbers<[1], [0], [0], [1], [0, 0, 1, 1], [], []>} : vector<200x64xbf16>, vector<64x128xbf16>, vector<200x128xf32> -> vector<200x128xf32>
    %c0_9 = arith.constant 0 : index
    %c0_10 = arith.constant 0 : index
    %12 = vector.load %arg5[%c0_9, %c0_10] : memref<1x128xf32, #tpu.memory_space<vmem>>, vector<1x128xf32>
    %13 = vector.broadcast %12 : vector<1x128xf32> to vector<200x128xf32>
    %14 = arith.addf %11, %13 : vector<200x128xf32>
    %15 = vector.extract_strided_slice %14 {offsets = [0, 0], sizes = [200, 16], strides = [1, 1]} : vector<200x128xf32> to vector<200x16xf32>
    %c0_11 = arith.constant 0 : index
    %c0_12 = arith.constant 0 : index
    %16 = vector.load %arg6[%c0_11, %c0_12] : memref<200x16xf32, #tpu.memory_space<vmem>>, vector<200x16xf32>
    tpu.vector_store %arg6[%c0_11, %c0_12], %15 {strides = array<i32>} : memref<200x16xf32, #tpu.memory_space<vmem>>, vector<200x16xf32>,
    return
  }
  func.func @transform_0(%arg0: i32) -> (i32, i32) {
    %c0_i32 = arith.constant 0 : i32
    %c0_i32_0 = arith.constant 0 : i32
    return %arg0, %c0_i32 : i32, i32
  }
  func.func @transform_1(%arg0: i32) -> (i32, i32) {
    %c0_i32 = arith.constant 0 : i32
    %c0_i32_0 = arith.constant 0 : i32
    %c0_i32_1 = arith.constant 0 : i32
    return %c0_i32, %c0_i32_0 : i32, i32
  }
  func.func @transform_2(%arg0: i32) -> (i32, i32) {
    %c0_i32 = arith.constant 0 : i32
    %c0_i32_0 = arith.constant 0 : i32
    %c0_i32_1 = arith.constant 0 : i32
    return %c0_i32, %c0_i32_0 : i32, i32
  }
  func.func @transform_3(%arg0: i32) -> (i32, i32) {
    %c0_i32 = arith.constant 0 : i32
    %c0_i32_0 = arith.constant 0 : i32
    %c0_i32_1 = arith.constant 0 : i32
    return %c0_i32, %c0_i32_0 : i32, i32
  }
  func.func @transform_4(%arg0: i32) -> (i32, i32) {
    %c0_i32 = arith.constant 0 : i32
    %c0_i32_0 = arith.constant 0 : i32
    %c0_i32_1 = arith.constant 0 : i32
    return %c0_i32, %c0_i32_0 : i32, i32
  }
  func.func @transform_5(%arg0: i32) -> (i32, i32) {
    %c0_i32 = arith.constant 0 : i32
    %c0_i32_0 = arith.constant 0 : i32
    return %arg0, %c0_i32 : i32, i32
  }
}

</mosaic_0001>

<bundles_post_ra>
// kernel: tpu_custom_call.1
= control target key start
LH: loop header
LB: loop body
LE: loop exit
PB: predicated region body
PF: predicated region fallthrough
CT: control target
= control target key end

     0   :  { %v731_v0 = vmov 0.0   ;;  %vm732_vm0 = vmmov 0   ;;  %vm82_vm1 = vcmask 261120   ;;  %vm335_vm2 = vcmask 523264   ;;  %s1100_s1 = inlined_call_operand.vmem [shape: bf16[32,64], index: 1, kind: input, shape index: {}]   ;;  %s1101_s0 = inlined_call_operand.vmem [shape: f32[200,32], index: 0, kind: input, shape index: {}]   ;;  %s1102_s3 = inlined_call_operand.vmem [shape: bf16[64,128], index: 3, kind: input, shape index: {}]   ;;  %s1103_s2 = inlined_call_operand.vmem [shape: f32[1,64], index: 2, kind: input, shape index: {}]   ;;  %s1104_s4 = inlined_call_operand.vmem [shape: f32[1,128], index: 4, kind: input, shape index: {}]   ;;  %s1105_s5 = inlined_call_operand.vmem [shape: f32[200,16], index: 5, kind: output, shape index: {}]  }
   0x1   :  { %607 = vmatprep.subr.bf16.mxu0 %v731_v0  ;;  %v725_v1 = vld [vmem:[%s1100_s1] sm:$0xff]   ;;  %611 = vmatprep.mubr.msk.bf16.mxu0 %vm732_vm0, %v731_v0  ;;  %v726_v2 = vld [vmem:[%s1100_s1 + $0x8] sm:$0xff]   ;;  %v23_v6 = vld [vmem:[%s1101_s0 + $0x10] sm:$0xff]  ;;  %vm511_vm3 = vcmask 130048  }
   0x2   :  { %663 = vmatprep.subr.bf16.mxu1 %v731_v0  ;;  %671 = vmatprep.mubr.msk.bf16.mxu1 %vm732_vm0, %v731_v0  ;;  %v21_v3 = vld [vmem:[%s1101_s0] sm:$0xff]  ;;  %v22_v4 = vld [vmem:[%s1101_s0 + $0x8] sm:$0xff]  ;;  %v24_v7 = vld [vmem:[%s1101_s0 + $0x18] sm:$0xff] }
   0x3   :  { %608 = vmatpush3.bf16.msra.mxu0 %v725_v1  ;;  %v46_v5 = vpack.c.bf16 %v22_v4, %v21_v3  ;;  %v727_v8 = vld [vmem:[%s1102_s3] sm:$0xff]   ;;  %v728_v9 = vld [vmem:[%s1102_s3 + $0x8] sm:$0xff]   ;;  %v47_v10 = vpack.c.bf16 %v24_v7, %v23_v6  ;;  %v27_v14 = vld [vmem:[%s1101_s0 + $0x30] sm:$0xff] }
   0x4   :  { %609 = vmatprep.subr.bf16.mxu0 %v731_v0  ;;  %664 = vmatpush3.bf16.msra.mxu1 %v727_v8  ;;  %v25_v11 = vld [vmem:[%s1101_s0 + $0x20] sm:$0xff]  ;;  %v26_v12 = vld [vmem:[%s1101_s0 + $0x28] sm:$0xff]  ;;  %v28_v15 = vld [vmem:[%s1101_s0 + $0x38] sm:$0xff] }
   0x5   :  { %665 = vmatprep.subr.bf16.mxu1 %v731_v0  ;;  %v48_v13 = vpack.c.bf16 %v26_v12, %v25_v11  ;;  %v49_v16 = vpack.c.bf16 %v28_v15, %v27_v14  ;;  %v29_v17 = vld [vmem:[%s1101_s0 + $0x40] sm:$0xff]  ;;  %v30_v18 = vld [vmem:[%s1101_s0 + $0x48] sm:$0xff]  ;;  %v31_v20 = vld [vmem:[%s1101_s0 + $0x50] sm:$0xff] }
   0x6   :  { %v50_v19 = vpack.c.bf16 %v30_v18, %v29_v17  ;;  %v32_v21 = vld [vmem:[%s1101_s0 + $0x58] sm:$0xff]  ;;  %v33_v23 = vld [vmem:[%s1101_s0 + $0x60] sm:$0xff]  ;;  %v34_v24 = vld [vmem:[%s1101_s0 + $0x68] sm:$0xff] }
   0x7   :  { %610 = vmatpush3.bf16.msra.mxu0 %v726_v2  ;;  %v51_v22 = vpack.c.bf16 %v32_v21, %v31_v20  ;;  %v52_v25 = vpack.c.bf16 %v34_v24, %v33_v23  ;;  %v35_v26 = vld [vmem:[%s1101_s0 + $0x70] sm:$0xff]  ;;  %v36_v27 = vld [vmem:[%s1101_s0 + $0x78] sm:$0xff]  ;;  %v37_v29 = vld [vmem:[%s1101_s0 + $0x80] sm:$0xff] }
   0x8   :  { %666 = vmatpush3.bf16.msra.mxu1 %v728_v9  ;;  %v53_v28 = vpack.c.bf16 %v36_v27, %v35_v26  ;;  %v38_v30 = vld [vmem:[%s1101_s0 + $0x88] sm:$0xff]  ;;  %v39_v32 = vld [vmem:[%s1101_s0 + $0x90] sm:$0xff]  ;;  %v40_v33 = vld [vmem:[%s1101_s0 + $0x98] sm:$0xff] }
   0x9   :  { %667 = vmatprep.subr.bf16.mxu1 %v731_v0  ;;  %v54_v31 = vpack.c.bf16 %v38_v30, %v37_v29  ;;  %v55_v34 = vpack.c.bf16 %v40_v33, %v39_v32  ;;  %v41_v35 = vld [vmem:[%s1101_s0 + $0xa0] sm:$0xff]  ;;  %v42_v36 = vld [vmem:[%s1101_s0 + $0xa8] sm:$0xff]  ;;  %v43_v38 = vld [vmem:[%s1101_s0 + $0xb0] sm:$0xff] }
   0xa   :  { %612 = vmatmul.mubr.msk.bf16.vlgmr.msra.gmra.mrb[0].mxu0 %vm82_vm1, %v46_v5  ;;  %v56_v37 = vpack.c.bf16 %v42_v36, %v41_v35  ;;  %v44_v39 = vld [vmem:[%s1101_s0 + $0xb8] sm:$0xff]  ;;  %v729_v40 = vld [vmem:[%s1102_s3 + $0x10] sm:$0xff]   ;;  %v45_v43 = vld [vmem:[%s1101_s0 + $0xc0] sm:$0xff] }
   0xb   :  { %615 = vmatprep.mubr.msk.bf16.mxu0 %vm732_vm0, %v731_v0  ;;  %v57_v41 = vpack.c.bf16 %v44_v39, %v43_v38  ;;  %v730_v42 = vld [vmem:[%s1102_s3 + $0x18] sm:$0xff]   ;;  %v58_v44 = vpack.c.bf16 %v45_v43, %v45_v43  ;;  %v906_v45 = vld [vmem:[%s1103_s2] ss:$0 sm:$0xff] }
   0xc   :  { %668 = vmatpush3.bf16.msra.mxu1 %v729_v40 }
   0xd   :  { %669 = vmatprep.subr.bf16.mxu1 %v731_v0 }
  0x10   :  { %670 = vmatpush3.bf16.msra.mxu1 %v730_v42 }
  0x12   :  { %616 = vmatmul.mubr.msk.bf16.gmra.mrb[4].mxu0 %vm82_vm1, %v47_v10 }
  0x13   :  { %619 = vmatprep.mubr.msk.bf16.mxu0 %vm732_vm0, %v731_v0 }
  0x1a   :  { %620 = vmatmul.mubr.msk.bf16.gmra.mrb[8].mxu0 %vm82_vm1, %v48_v13 }
  0x1b   :  { %623 = vmatprep.mubr.msk.bf16.mxu0 %vm732_vm0, %v731_v0 }
  0x22   :  { %624 = vmatmul.mubr.msk.bf16.gmra.mrb[12].mxu0 %vm82_vm1, %v49_v16 }
  0x23   :  { %627 = vmatprep.mubr.msk.bf16.mxu0 %vm732_vm0, %v731_v0 }
  0x2a   :  { %628 = vmatmul.mubr.msk.bf16.gmra.mrb[16].mxu0 %vm82_vm1, %v50_v19 }
  0x2b   :  { %631 = vmatprep.mubr.msk.bf16.mxu0 %vm732_vm0, %v731_v0 }
  0x32   :  { %632 = vmatmul.mubr.msk.bf16.gmra.mrb[20].mxu0 %vm82_vm1, %v51_v22 }
  0x33   :  { %635 = vmatprep.mubr.msk.bf16.mxu0 %vm732_vm0, %v731_v0 }
  0x3a   :  { %636 = vmatmul.mubr.msk.bf16.gmra.mrb[24].mxu0 %vm82_vm1, %v52_v25 }
  0x3b   :  { %639 = vmatprep.mubr.msk.bf16.mxu0 %vm732_vm0, %v731_v0 }
  0x42   :  { %640 = vmatmul.mubr.msk.bf16.gmra.mrb[28].mxu0 %vm82_vm1, %v53_v28 }
  0x43   :  { %643 = vmatprep.mubr.msk.bf16.mxu0 %vm732_vm0, %v731_v0 }
  0x4a   :  { %644 = vmatmul.mubr.msk.bf16.gmra.mrb[32].mxu0 %vm82_vm1, %v54_v31 }
  0x4b   :  { %647 = vmatprep.mubr.msk.bf16.mxu0 %vm732_vm0, %v731_v0 }
  0x52   :  { %648 = vmatmul.mubr.msk.bf16.gmra.mrb[36].mxu0 %vm82_vm1, %v55_v34 }
  0x53   :  { %651 = vmatprep.mubr.msk.bf16.mxu0 %vm732_vm0, %v731_v0 }
  0x5a   :  { %652 = vmatmul.mubr.msk.bf16.gmra.mrb[40].mxu0 %vm82_vm1, %v56_v37 }
  0x5b   :  { %655 = vmatprep.mubr.msk.bf16.mxu0 %vm732_vm0, %v731_v0 }
  0x62   :  { %656 = vmatmul.mubr.msk.bf16.gmra.mrb[44].mxu0 %vm82_vm1, %v57_v41 }
  0x63   :  { %659 = vmatprep.mubr.msk.bf16.mxu0 %vm732_vm0, %v731_v0 }
  0x6a   :  { %660 = vmatmul.mubr.msk.bf16.gmra.mrb[48].mxu0 %vm82_vm1, %v58_v44 }
  0xdd   :  { %v156_v46 = vpop.f32.mrb[0].mxu0 }
  0xde   :  { %v157_v47 = vadd.f32 %v906_v45, %v156_v46  ;;  %v613_v48 = vpop.f32.mrb[1].mxu0 }
  0xdf   :  { %v159_v49 = vpop.f32.mrb[2].mxu0 }
  0xe0   :  { %v160_v50 = vadd.f32 %v906_v45, %v159_v49  ;;  %v614_v51 = vpop.f32.mrb[3].mxu0  ;;  %v258_v52 = vmax.f32 %v157_v47, 0.0 }
  0xe2   :  { %v259_v53 = vmax.f32 %v160_v50, 0.0 }
  0xe4   :  { %v283_v54 = vpack.c.bf16 %v259_v53, %v258_v52 }
  0xe5   :  { %v164_v55 = vpop.f32.mrb[4].mxu0 }
  0xe6   :  { %v165_v56 = vadd.f32 %v906_v45, %v164_v55  ;;  %v617_v57 = vpop.f32.mrb[5].mxu0  ;;  %672 = vmatmul.mubr.msk.bf16.vlgmr.msra.gmra.mrb[0].mxu1 %vm335_vm2, %v283_v54 }
  0xe7   :  { %v167_v58 = vpop.f32.mrb[6].mxu0  ;;  %675 = vmatprep.mubr.msk.bf16.mxu1 %vm732_vm0, %v731_v0 }
  0xe8   :  { %v168_v59 = vadd.f32 %v906_v45, %v167_v58  ;;  %v618_v60 = vpop.f32.mrb[7].mxu0  ;;  %v260_v61 = vmax.f32 %v165_v56, 0.0 }
  0xea   :  { %v261_v62 = vmax.f32 %v168_v59, 0.0 }
  0xec   :  { %v284_v63 = vpack.c.bf16 %v261_v62, %v260_v61 }
  0xed   :  { %v172_v1 = vpop.f32.mrb[8].mxu0 }
  0xee   :  { %v173_v2 = vadd.f32 %v906_v45, %v172_v1  ;;  %v621_v3 = vpop.f32.mrb[9].mxu0  ;;  %676 = vmatmul.mubr.msk.bf16.gmra.mrb[4].mxu1 %vm335_vm2, %v284_v63 }
  0xef   :  { %v175_v4 = vpop.f32.mrb[10].mxu0  ;;  %679 = vmatprep.mubr.msk.bf16.mxu1 %vm732_vm0, %v731_v0 }
  0xf0   :  { %v176_v5 = vadd.f32 %v906_v45, %v175_v4  ;;  %v622_v6 = vpop.f32.mrb[11].mxu0  ;;  %v262_v7 = vmax.f32 %v173_v2, 0.0 }
  0xf2   :  { %v263_v8 = vmax.f32 %v176_v5, 0.0 }
  0xf4   :  { %v285_v9 = vpack.c.bf16 %v263_v8, %v262_v7 }
  0xf5   :  { %v180_v10 = vpop.f32.mrb[12].mxu0 }
  0xf6   :  { %v181_v11 = vadd.f32 %v906_v45, %v180_v10  ;;  %v625_v12 = vpop.f32.mrb[13].mxu0  ;;  %680 = vmatmul.mubr.msk.bf16.gmra.mrb[8].mxu1 %vm335_vm2, %v285_v9 }
  0xf7   :  { %v183_v13 = vpop.f32.mrb[14].mxu0  ;;  %683 = vmatprep.mubr.msk.bf16.mxu1 %vm732_vm0, %v731_v0 }
  0xf8   :  { %v184_v14 = vadd.f32 %v906_v45, %v183_v13  ;;  %v626_v15 = vpop.f32.mrb[15].mxu0  ;;  %v264_v16 = vmax.f32 %v181_v11, 0.0 }
  0xfa   :  { %v265_v17 = vmax.f32 %v184_v14, 0.0 }
  0xfc   :  { %v286_v18 = vpack.c.bf16 %v265_v17, %v264_v16 }
  0xfd   :  { %v188_v19 = vpop.f32.mrb[16].mxu0 }
  0xfe   :  { %v189_v20 = vadd.f32 %v906_v45, %v188_v19  ;;  %v629_v21 = vpop.f32.mrb[17].mxu0  ;;  %684 = vmatmul.mubr.msk.bf16.gmra.mrb[12].mxu1 %vm335_vm2, %v286_v18 }
  0xff   :  { %v191_v22 = vpop.f32.mrb[18].mxu0  ;;  %687 = vmatprep.mubr.msk.bf16.mxu1 %vm732_vm0, %v731_v0 }
 0x100   :  { %v192_v23 = vadd.f32 %v906_v45, %v191_v22  ;;  %v630_v24 = vpop.f32.mrb[19].mxu0  ;;  %v266_v25 = vmax.f32 %v189_v20, 0.0 }
 0x102   :  { %v267_v26 = vmax.f32 %v192_v23, 0.0 }
 0x104   :  { %v287_v27 = vpack.c.bf16 %v267_v26, %v266_v25 }
 0x105   :  { %v196_v28 = vpop.f32.mrb[20].mxu0 }
 0x106   :  { %v197_v29 = vadd.f32 %v906_v45, %v196_v28  ;;  %v633_v30 = vpop.f32.mrb[21].mxu0  ;;  %688 = vmatmul.mubr.msk.bf16.gmra.mrb[16].mxu1 %vm335_vm2, %v287_v27 }
 0x107   :  { %v199_v31 = vpop.f32.mrb[22].mxu0  ;;  %691 = vmatprep.mubr.msk.bf16.mxu1 %vm732_vm0, %v731_v0 }
 0x108   :  { %v200_v32 = vadd.f32 %v906_v45, %v199_v31  ;;  %v634_v33 = vpop.f32.mrb[23].mxu0  ;;  %v268_v34 = vmax.f32 %v197_v29, 0.0 }
 0x10a   :  { %v269_v35 = vmax.f32 %v200_v32, 0.0 }
 0x10c   :  { %v288_v36 = vpack.c.bf16 %v269_v35, %v268_v34 }
 0x10d   :  { %v204_v37 = vpop.f32.mrb[24].mxu0 }
 0x10e   :  { %v205_v38 = vadd.f32 %v906_v45, %v204_v37  ;;  %v637_v39 = vpop.f32.mrb[25].mxu0  ;;  %692 = vmatmul.mubr.msk.bf16.gmra.mrb[20].mxu1 %vm335_vm2, %v288_v36  ;;  %v973_v36 = vld [vmem:[%s1104_s4] ss:$0 sm:$0xff] }
 0x10f   :  { %v207_v40 = vpop.f32.mrb[26].mxu0  ;;  %695 = vmatprep.mubr.msk.bf16.mxu1 %vm732_vm0, %v731_v0 }
 0x110   :  { %v208_v41 = vadd.f32 %v906_v45, %v207_v40  ;;  %v638_v42 = vpop.f32.mrb[27].mxu0  ;;  %v270_v43 = vmax.f32 %v205_v38, 0.0 }
 0x112   :  { %v271_v44 = vmax.f32 %v208_v41, 0.0 }
 0x114   :  { %v289_v46 = vpack.c.bf16 %v271_v44, %v270_v43 }
 0x115   :  { %v212_v47 = vpop.f32.mrb[28].mxu0 }
 0x116   :  { %v213_v48 = vadd.f32 %v906_v45, %v212_v47  ;;  %v641_v49 = vpop.f32.mrb[29].mxu0  ;;  %696 = vmatmul.mubr.msk.bf16.gmra.mrb[24].mxu1 %vm335_vm2, %v289_v46 }
 0x117   :  { %v215_v50 = vpop.f32.mrb[30].mxu0  ;;  %699 = vmatprep.mubr.msk.bf16.mxu1 %vm732_vm0, %v731_v0 }
 0x118   :  { %v216_v51 = vadd.f32 %v906_v45, %v215_v50  ;;  %v642_v52 = vpop.f32.mrb[31].mxu0  ;;  %v272_v53 = vmax.f32 %v213_v48, 0.0 }
 0x11a   :  { %v273_v54 = vmax.f32 %v216_v51, 0.0 }
 0x11c   :  { %v290_v55 = vpack.c.bf16 %v273_v54, %v272_v53 }
 0x11d   :  { %v220_v56 = vpop.f32.mrb[32].mxu0 }
 0x11e   :  { %v221_v57 = vadd.f32 %v906_v45, %v220_v56  ;;  %v645_v58 = vpop.f32.mrb[33].mxu0  ;;  %700 = vmatmul.mubr.msk.bf16.gmra.mrb[28].mxu1 %vm335_vm2, %v290_v55 }
 0x11f   :  { %v223_v59 = vpop.f32.mrb[34].mxu0  ;;  %703 = vmatprep.mubr.msk.bf16.mxu1 %vm732_vm0, %v731_v0 }
 0x120   :  { %v224_v60 = vadd.f32 %v906_v45, %v223_v59  ;;  %v646_v61 = vpop.f32.mrb[35].mxu0  ;;  %v274_v62 = vmax.f32 %v221_v57, 0.0 }
 0x122   :  { %v275_v63 = vmax.f32 %v224_v60, 0.0 }
 0x124   :  { %v291_v1 = vpack.c.bf16 %v275_v63, %v274_v62 }
 0x125   :  { %v228_v2 = vpop.f32.mrb[36].mxu0 }
 0x126   :  { %v229_v3 = vadd.f32 %v906_v45, %v228_v2  ;;  %v649_v4 = vpop.f32.mrb[37].mxu0  ;;  %704 = vmatmul.mubr.msk.bf16.gmra.mrb[32].mxu1 %vm335_vm2, %v291_v1 }
 0x127   :  { %v231_v5 = vpop.f32.mrb[38].mxu0  ;;  %707 = vmatprep.mubr.msk.bf16.mxu1 %vm732_vm0, %v731_v0 }
 0x128   :  { %v232_v6 = vadd.f32 %v906_v45, %v231_v5  ;;  %v650_v7 = vpop.f32.mrb[39].mxu0  ;;  %v276_v8 = vmax.f32 %v229_v3, 0.0 }
 0x12a   :  { %v277_v9 = vmax.f32 %v232_v6, 0.0 }
 0x12c   :  { %v292_v10 = vpack.c.bf16 %v277_v9, %v276_v8 }
 0x12d   :  { %v236_v11 = vpop.f32.mrb[40].mxu0 }
 0x12e   :  { %v237_v12 = vadd.f32 %v906_v45, %v236_v11  ;;  %v653_v13 = vpop.f32.mrb[41].mxu0  ;;  %708 = vmatmul.mubr.msk.bf16.gmra.mrb[36].mxu1 %vm335_vm2, %v292_v10 }
 0x12f   :  { %v239_v14 = vpop.f32.mrb[42].mxu0  ;;  %711 = vmatprep.mubr.msk.bf16.mxu1 %vm732_vm0, %v731_v0 }
 0x130   :  { %v240_v15 = vadd.f32 %v906_v45, %v239_v14  ;;  %v654_v16 = vpop.f32.mrb[43].mxu0  ;;  %v278_v17 = vmax.f32 %v237_v12, 0.0 }
 0x132   :  { %v279_v18 = vmax.f32 %v240_v15, 0.0 }
 0x134   :  { %v293_v19 = vpack.c.bf16 %v279_v18, %v278_v17 }
 0x135   :  { %v244_v20 = vpop.f32.mrb[44].mxu0 }
 0x136   :  { %v245_v21 = vadd.f32 %v906_v45, %v244_v20  ;;  %v657_v22 = vpop.f32.mrb[45].mxu0  ;;  %712 = vmatmul.mubr.msk.bf16.gmra.mrb[40].mxu1 %vm335_vm2, %v293_v19 }
 0x137   :  { %v247_v23 = vpop.f32.mrb[46].mxu0  ;;  %715 = vmatprep.mubr.msk.bf16.mxu1 %vm732_vm0, %v731_v0 }
 0x138   :  { %v248_v24 = vadd.f32 %v906_v45, %v247_v23  ;;  %v658_v25 = vpop.f32.mrb[47].mxu0  ;;  %v280_v26 = vmax.f32 %v245_v21, 0.0 }
 0x13a   :  { %v281_v27 = vmax.f32 %v248_v24, 0.0 }
 0x13c   :  { %v294_v28 = vpack.c.bf16 %v281_v27, %v280_v26 }
 0x13d   :  { %v252_v29 = vpop.f32.mrb[48].mxu0 }
 0x13e   :  { %v253_v30 = vadd.f32 %v906_v45, %v252_v29  ;;  %v661_v31 = vpop.f32.mrb[49].mxu0  ;;  %716 = vmatmul.mubr.msk.bf16.gmra.mrb[44].mxu1 %vm335_vm2, %v294_v28 }
 0x13f   :  { %v255_v32 = vpop.f32.mrb[50].mxu0  ;;  %719 = vmatprep.mubr.msk.bf16.mxu1 %vm732_vm0, %v731_v0 }
 0x140   :  { %v282_v33 = vmax.f32 %v253_v30, 0.0  ;;  %v662_v34 = vpop.f32.mrb[51].mxu0 }
 0x142   :  { %v295_v35 = vpack.c.bf16 %v282_v33, %v282_v33 }
 0x146   :  { %720 = vmatmul.mubr.msk.bf16.gmra.mrb[48].mxu1 %vm335_vm2, %v295_v35 }
 0x1b9   :  { %v409_v37 = vpop.f32.mrb[0].mxu1 }
 0x1ba   :  { %v410_v45 = vadd.f32 %v973_v36, %v409_v37  ;;  %v673_v38 = vpop.f32.mrb[1].mxu1 }
 0x1bb   :  { %v412_v39 = vpop.f32.mrb[2].mxu1 }
 0x1bc   :  { %512 = vst.msk [vmem:[%s1105_s5] sm:$0xff] %vm511_vm3, %v410_v45  ;;  %v413_v0 = vadd.f32 %v973_v36, %v412_v39  ;;  %v674_v40 = vpop.f32.mrb[3].mxu1 }
 0x1be   :  { %513 = vst.msk [vmem:[%s1105_s5 + $0x8] sm:$0xff] %vm511_vm3, %v413_v0 }
 0x1c1   :  { %v417_v41 = vpop.f32.mrb[4].mxu1 }
 0x1c2   :  { %v418_v42 = vadd.f32 %v973_v36, %v417_v41  ;;  %v677_v43 = vpop.f32.mrb[5].mxu1 }
 0x1c3   :  { %v420_v44 = vpop.f32.mrb[6].mxu1 }
 0x1c4   :  { %514 = vst.msk [vmem:[%s1105_s5 + $0x10] sm:$0xff] %vm511_vm3, %v418_v42  ;;  %v421_v46 = vadd.f32 %v973_v36, %v420_v44  ;;  %v678_v47 = vpop.f32.mrb[7].mxu1 }
 0x1c6   :  { %515 = vst.msk [vmem:[%s1105_s5 + $0x18] sm:$0xff] %vm511_vm3, %v421_v46 }
 0x1c9   :  { %v425_v48 = vpop.f32.mrb[8].mxu1 }
 0x1ca   :  { %v426_v49 = vadd.f32 %v973_v36, %v425_v48  ;;  %v681_v50 = vpop.f32.mrb[9].mxu1 }
 0x1cb   :  { %v428_v51 = vpop.f32.mrb[10].mxu1 }
 0x1cc   :  { %516 = vst.msk [vmem:[%s1105_s5 + $0x20] sm:$0xff] %vm511_vm3, %v426_v49  ;;  %v429_v52 = vadd.f32 %v973_v36, %v428_v51  ;;  %v682_v53 = vpop.f32.mrb[11].mxu1 }
 0x1ce   :  { %517 = vst.msk [vmem:[%s1105_s5 + $0x28] sm:$0xff] %vm511_vm3, %v429_v52 }
 0x1d1   :  { %v433_v54 = vpop.f32.mrb[12].mxu1 }
 0x1d2   :  { %v434_v55 = vadd.f32 %v973_v36, %v433_v54  ;;  %v685_v56 = vpop.f32.mrb[13].mxu1 }
 0x1d3   :  { %v436_v57 = vpop.f32.mrb[14].mxu1 }
 0x1d4   :  { %518 = vst.msk [vmem:[%s1105_s5 + $0x30] sm:$0xff] %vm511_vm3, %v434_v55  ;;  %v437_v58 = vadd.f32 %v973_v36, %v436_v57  ;;  %v686_v59 = vpop.f32.mrb[15].mxu1 }
 0x1d6   :  { %519 = vst.msk [vmem:[%s1105_s5 + $0x38] sm:$0xff] %vm511_vm3, %v437_v58 }
 0x1d9   :  { %v441_v60 = vpop.f32.mrb[16].mxu1 }
 0x1da   :  { %v442_v61 = vadd.f32 %v973_v36, %v441_v60  ;;  %v689_v62 = vpop.f32.mrb[17].mxu1 }
 0x1db   :  { %v444_v63 = vpop.f32.mrb[18].mxu1 }
 0x1dc   :  { %520 = vst.msk [vmem:[%s1105_s5 + $0x40] sm:$0xff] %vm511_vm3, %v442_v61  ;;  %v445_v1 = vadd.f32 %v973_v36, %v444_v63  ;;  %v690_v2 = vpop.f32.mrb[19].mxu1 }
 0x1de   :  { %521 = vst.msk [vmem:[%s1105_s5 + $0x48] sm:$0xff] %vm511_vm3, %v445_v1 }
 0x1e1   :  { %v449_v3 = vpop.f32.mrb[20].mxu1 }
 0x1e2   :  { %v450_v4 = vadd.f32 %v973_v36, %v449_v3  ;;  %v693_v5 = vpop.f32.mrb[21].mxu1 }
 0x1e3   :  { %v452_v6 = vpop.f32.mrb[22].mxu1 }
 0x1e4   :  { %522 = vst.msk [vmem:[%s1105_s5 + $0x50] sm:$0xff] %vm511_vm3, %v450_v4  ;;  %v453_v7 = vadd.f32 %v973_v36, %v452_v6  ;;  %v694_v8 = vpop.f32.mrb[23].mxu1 }
 0x1e6   :  { %523 = vst.msk [vmem:[%s1105_s5 + $0x58] sm:$0xff] %vm511_vm3, %v453_v7 }
 0x1e9   :  { %v457_v9 = vpop.f32.mrb[24].mxu1 }
 0x1ea   :  { %v458_v10 = vadd.f32 %v973_v36, %v457_v9  ;;  %v697_v11 = vpop.f32.mrb[25].mxu1 }
 0x1eb   :  { %v460_v12 = vpop.f32.mrb[26].mxu1 }
 0x1ec   :  { %524 = vst.msk [vmem:[%s1105_s5 + $0x60] sm:$0xff] %vm511_vm3, %v458_v10  ;;  %v461_v13 = vadd.f32 %v973_v36, %v460_v12  ;;  %v698_v14 = vpop.f32.mrb[27].mxu1 }
 0x1ee   :  { %525 = vst.msk [vmem:[%s1105_s5 + $0x68] sm:$0xff] %vm511_vm3, %v461_v13 }
 0x1f1   :  { %v465_v15 = vpop.f32.mrb[28].mxu1 }
 0x1f2   :  { %v466_v16 = vadd.f32 %v973_v36, %v465_v15  ;;  %v701_v17 = vpop.f32.mrb[29].mxu1 }
 0x1f3   :  { %v468_v18 = vpop.f32.mrb[30].mxu1 }
 0x1f4   :  { %526 = vst.msk [vmem:[%s1105_s5 + $0x70] sm:$0xff] %vm511_vm3, %v466_v16  ;;  %v469_v19 = vadd.f32 %v973_v36, %v468_v18  ;;  %v702_v20 = vpop.f32.mrb[31].mxu1 }
 0x1f6   :  { %527 = vst.msk [vmem:[%s1105_s5 + $0x78] sm:$0xff] %vm511_vm3, %v469_v19 }
 0x1f9   :  { %v473_v21 = vpop.f32.mrb[32].mxu1 }
 0x1fa   :  { %v474_v22 = vadd.f32 %v973_v36, %v473_v21  ;;  %v705_v23 = vpop.f32.mrb[33].mxu1 }
 0x1fb   :  { %v476_v24 = vpop.f32.mrb[34].mxu1 }
 0x1fc   :  { %528 = vst.msk [vmem:[%s1105_s5 + $0x80] sm:$0xff] %vm511_vm3, %v474_v22  ;;  %v477_v25 = vadd.f32 %v973_v36, %v476_v24  ;;  %v706_v26 = vpop.f32.mrb[35].mxu1 }
 0x1fe   :  { %529 = vst.msk [vmem:[%s1105_s5 + $0x88] sm:$0xff] %vm511_vm3, %v477_v25 }
 0x201   :  { %v481_v27 = vpop.f32.mrb[36].mxu1 }
 0x202   :  { %v482_v28 = vadd.f32 %v973_v36, %v481_v27  ;;  %v709_v29 = vpop.f32.mrb[37].mxu1 }
 0x203   :  { %v484_v30 = vpop.f32.mrb[38].mxu1 }
 0x204   :  { %530 = vst.msk [vmem:[%s1105_s5 + $0x90] sm:$0xff] %vm511_vm3, %v482_v28  ;;  %v485_v31 = vadd.f32 %v973_v36, %v484_v30  ;;  %v710_v32 = vpop.f32.mrb[39].mxu1 }
 0x206   :  { %531 = vst.msk [vmem:[%s1105_s5 + $0x98] sm:$0xff] %vm511_vm3, %v485_v31 }
 0x209   :  { %v489_v33 = vpop.f32.mrb[40].mxu1 }
 0x20a   :  { %v490_v34 = vadd.f32 %v973_v36, %v489_v33  ;;  %v713_v35 = vpop.f32.mrb[41].mxu1 }
 0x20b   :  { %v492_v37 = vpop.f32.mrb[42].mxu1 }
 0x20c   :  { %532 = vst.msk [vmem:[%s1105_s5 + $0xa0] sm:$0xff] %vm511_vm3, %v490_v34  ;;  %v493_v45 = vadd.f32 %v973_v36, %v492_v37  ;;  %v714_v38 = vpop.f32.mrb[43].mxu1 }
 0x20e   :  { %533 = vst.msk [vmem:[%s1105_s5 + $0xa8] sm:$0xff] %vm511_vm3, %v493_v45 }
 0x211   :  { %v497_v39 = vpop.f32.mrb[44].mxu1 }
 0x212   :  { %v498_v0 = vadd.f32 %v973_v36, %v497_v39  ;;  %v717_v40 = vpop.f32.mrb[45].mxu1 }
 0x213   :  { %v500_v41 = vpop.f32.mrb[46].mxu1 }
 0x214   :  { %534 = vst.msk [vmem:[%s1105_s5 + $0xb0] sm:$0xff] %vm511_vm3, %v498_v0  ;;  %v501_v42 = vadd.f32 %v973_v36, %v500_v41  ;;  %v718_v43 = vpop.f32.mrb[47].mxu1 }
 0x216   :  { %535 = vst.msk [vmem:[%s1105_s5 + $0xb8] sm:$0xff] %vm511_vm3, %v501_v42 }
 0x219   :  { %v505_v44 = vpop.f32.mrb[48].mxu1 }
 0x21a   :  { %v506_v46 = vadd.f32 %v973_v36, %v505_v44  ;;  %v721_v47 = vpop.f32.mrb[49].mxu1 }
 0x21b   :  { %v508_v48 = vpop.f32.mrb[50].mxu1 }
 0x21c   :  { %536 = vst.msk [vmem:[%s1105_s5 + $0xc0] sm:$0xff] %vm511_vm3, %v506_v46  ;;  %v722_v49 = vpop.f32.mrb[51].mxu1 }

</bundles_post_ra>
